<compile_context>
chip_gen: v5e
topology: v5e:2x2
jax: 0.10.0
libtpu: 0.0.40
codegen_flags: <defaults>
</compile_context>

<pallas_src>
import functools
import math

import jax
import jax.numpy as jnp
from jax import lax
from jax.experimental import pallas as pl
from jax.experimental.pallas import tpu as pltpu


def _round_up(x, n):
    return (x + n - 1) // n * n


def _itemsize(dt):
    return jnp.dtype(dt).itemsize


def _vmem_footprint(tb, tc, f, x_b, w_b, out_b, mm_b):
    """Double-buffered pipeline tiles + cached normalized-W scratch + f32 temps."""
    return (2 * tb * f * x_b          # pre-normalized x tile (matmul dtype), 2 bufs
            + 2 * tc * f * w_b        # W tile, 2 bufs
            + 2 * tb * tc * out_b     # output tile, 2 bufs
            + tc * f * mm_b           # cached normalized-W scratch
            + 4 * tb * tc * 4         # live f32 epilogue temporaries on [tb, tc]
            + 2 * tb * 4)             # label tile


def _vmem_budget_and_cap():
    """Generation-dependent (tile budget, vmem_limit cap) in bytes."""
    cap = 64 * 1024 * 1024                        # conservative (v7x-sized) fallback
    try:
        cap = int(getattr(pltpu.get_tpu_info(), "vmem_capacity_bytes", cap))
    except Exception:
        pass
    if cap <= 64 * 1024 * 1024:                   # v7x: 64 MiB per TensorCore
        return 40 * 1024 * 1024, 48 * 1024 * 1024
    return 80 * 1024 * 1024, 100 * 1024 * 1024    # v5e / v6e: 128 MiB


def _pick_tiles(B, C, F, block_b, block_c, budget, x_b, w_b, out_b, mm_b):
    """Lane-dense tiles that keep the double-buffered pipeline inside `budget`."""
    TB = min(block_b, _round_up(B, 8))
    TC = min(block_c, _round_up(C, 128))
    while _vmem_footprint(TB, TC, F, x_b, w_b, out_b, mm_b) > budget:
        # Prefer shrinking the batch tile before the lane-dense class tile.
        if TB > 256:
            TB = max(8, _round_up(TB // 2, 8))
        elif TC > 512:
            TC = max(128, _round_up(TC // 2, 128))
        elif TB > 8:
            TB = max(8, _round_up(TB // 2, 8))
        elif TC > 128:
            TC = max(128, _round_up(TC // 2, 128))
        else:
            break
    return TB, TC


def _arcface_kernel(flag_ref, x_ref, w_ref, label_ref, out_ref, wn_ref, *,
                    s, cos_m, sin_m, block_c, n_c):
    j = pl.program_id(0)   # class-tile index (outer; W tile resident across i)
    i = pl.program_id(1)   # batch-tile index (inner)

    # Normalize this W tile once per class tile (hoisted out of the batch loop);
    # cache it in VMEM scratch already cast to the MXU input dtype.
    @pl.when(i == 0)
    def _():
        w = w_ref[...].astype(jnp.float32)
        w_inv = lax.rsqrt(
            jnp.maximum(jnp.sum(w * w, axis=-1, keepdims=True), 1e-24))
        wn_ref[...] = (w * w_inv).astype(wn_ref.dtype)

    # x arrives pre-normalized & pre-cast from the wrapper, so the inner loop
    # only streams the narrow tile.  logits = x_n @ w_n.T via a transpose-free
    # NT contraction of the lane dims (attention-style; feeds the MXU directly).
    logits = lax.dot_general(
        x_ref[...], wn_ref[...],
        dimension_numbers=(((1,), (1,)), ((), ())),
        preferred_element_type=jnp.float32)               # [TB, TC] f32

    # Labels local to this class tile: compare against a loop-invariant iota so
    # the per-step [TB, TC] integer add of the global column offset disappears.
    local = label_ref[...] - j * block_c                  # [TB, 1] int32
    cols = lax.broadcasted_iota(jnp.int32, logits.shape, 1)

    # Scalar-prefetched flag: does any label of batch tile i land in class tile j?
    has_target = flag_ref[i * n_c + j] > 0

    @pl.when(has_target)
    def _():
        # cos(theta + m) = c*cos(m) - sqrt(1 - c^2)*sin(m), c = clip(logits)
        # (identical to acos-then-cos for c in (-1, 1); matches the torch module,
        # which has no easy_margin / threshold handling).
        c = jnp.clip(logits, -1.0 + 1e-7, 1.0 - 1e-7)
        sin_theta = jnp.sqrt(jnp.maximum(1.0 - c * c, 0.0))
        target = c * cos_m - sin_theta * sin_m
        out = jnp.where(cols == local, target, logits)
        out_ref[...] = (out * s).astype(out_ref.dtype)

    @pl.when(jnp.logical_not(has_target))
    def _():
        # No label falls in this class tile: skip the whole margin epilogue.
        out_ref[...] = (logits * s).astype(out_ref.dtype)


def arcface_forward(x, W, label, *, s=30.0, m=0.5, matmul_dtype=jnp.bfloat16,
                    out_dtype=jnp.float32, block_b=512, block_c=2048):
    """ArcFace logits.

    x: [B, F], W: [C, F], label: [B] int -> [B, C] ArcFace-scaled logits.

    bf16 MXU operands are the default on all generations (the MXU is bf16-native
    everywhere and the op is HBM-bound); pass matmul_dtype=jnp.float32 for a
    bit-tight path.  W may be passed in bf16 to halve its HBM read; out_dtype
    may be set to bf16 to halve the output write.
    """
    B, F = x.shape
    C, F2 = W.shape
    assert F == F2

    x_b = _itemsize(matmul_dtype)
    w_b = _itemsize(W.dtype)
    out_b = _itemsize(out_dtype)
    mm_b = _itemsize(matmul_dtype)

    budget, vmem_cap = _vmem_budget_and_cap()
    TB, TC = _pick_tiles(B, C, F, _round_up(block_b, 8), _round_up(block_c, 128),
                         budget, x_b, w_b, out_b, mm_b)
    Bp = _round_up(B, TB)
    Cp = _round_up(C, TC)
    n_c, n_b = Cp // TC, Bp // TB

    # Normalize x once here (B*F work, negligible) and stream it in the matmul
    # dtype: with class-outer ordering the x tiles are re-read C/TC times.
    xf = x.astype(jnp.float32)
    x_n = (xf * lax.rsqrt(
        jnp.maximum(jnp.sum(xf * xf, axis=-1, keepdims=True), 1e-24))
           ).astype(matmul_dtype)

    x_p = jnp.pad(x_n, ((0, Bp - B), (0, 0))) if Bp != B else x_n
    w_p = jnp.pad(W, ((0, Cp - C), (0, 0))) if Cp != C else W
    lab = label.astype(jnp.int32)
    lab_p = jnp.pad(lab, (0, Bp - B)) if Bp != B else lab
    lab2d = lab_p.reshape(Bp, 1)

    # Per-(batch tile, class tile) flag: 1 iff some label of that batch tile
    # falls in that class tile.  Scalar-prefetched into SMEM; gates the margin
    # epilogue in the kernel.
    tile_idx = (jnp.arange(Bp, dtype=jnp.int32) // TB) * n_c + lab_p // TC
    tile_flag = jnp.zeros((n_b * n_c,), jnp.int32).at[tile_idx].max(1)

    kernel = functools.partial(
        _arcface_kernel, s=float(s),
        cos_m=math.cos(float(m)), sin_m=math.sin(float(m)),
        block_c=TC, n_c=n_c)

    footprint = _vmem_footprint(TB, TC, F, x_b, w_b, out_b, mm_b)
    vmem_limit = int(min(vmem_cap,
                         max(32 * 1024 * 1024, footprint + 8 * 1024 * 1024)))

    cost = pl.CostEstimate(
        flops=2 * Bp * Cp * F,
        transcendentals=Bp * Cp + Cp,                # per-logit sqrt + W-row rsqrt
        bytes_accessed=(Cp * F * w_b                 # W read once
                        + n_c * Bp * F * x_b         # x re-streamed per class tile
                        + n_c * Bp * 4               # labels
                        + Bp * Cp * out_b))          # output write

    out = pl.pallas_call(
        kernel,
        out_shape=jax.ShapeDtypeStruct((Bp, Cp), out_dtype),
        grid_spec=pltpu.PrefetchScalarGridSpec(
            num_scalar_prefetch=1,
            # Class tiles outer (parallel, megacore-shardable); batch tiles inner
            # (arbitrary) so each W tile is DMA'd + normalized exactly once.
            grid=(n_c, n_b),
            in_specs=[
                pl.BlockSpec((TB, F), lambda j, i, flag: (i, 0)),   # x_n (matmul dtype)
                pl.BlockSpec((TC, F), lambda j, i, flag: (j, 0)),   # W (resident over i)
                pl.BlockSpec((TB, 1), lambda j, i, flag: (i, 0)),   # labels
            ],
            out_specs=pl.BlockSpec((TB, TC), lambda j, i, flag: (i, j)),
            scratch_shapes=[pltpu.VMEM((TC, F), matmul_dtype)],     # cached normalized W
        ),
        compiler_params=pltpu.CompilerParams(
            dimension_semantics=("parallel", "arbitrary"),
            vmem_limit_bytes=vmem_limit,
        ),
        cost_estimate=cost,
    )(tile_flag, x_p, w_p, lab2d)

    return out[:B, :C]


if __name__ == "__main__":
    # Shapes implied by the reference code: num_features = model.fc.out_features = 4.
    # NOTE: at these toy sizes the op is launch-overhead bound; the tiled Pallas
    # path targets realistic ArcFace heads (num_classes in the 10k-100k range).
    B = 8
    num_features = 4
    num_classes = 16
    s, m = 30.0, 0.5

    key = jax.random.PRNGKey(0)
    k_x, k_w, k_l = jax.random.split(key, 3)

    x = jax.random.normal(k_x, (B, num_features), dtype=jnp.float32)
    # Deterministic xavier_uniform_-style init: U(-a, a), a = sqrt(6/(fan_in+fan_out))
    bound = (6.0 / (num_features + num_classes)) ** 0.5
    W = jax.random.uniform(k_w, (num_classes, num_features), dtype=jnp.float32,
                           minval=-bound, maxval=bound)
    label = jax.random.randint(k_l, (B,), 0, num_classes, dtype=jnp.int32)

    def reference(x, W, label, s, m):
        # Plain-JAX reference with the same math as the torch module.
        xn = x / jnp.maximum(jnp.linalg.norm(x, axis=-1, keepdims=True), 1e-12)
        wn = W / jnp.maximum(jnp.linalg.norm(W, axis=-1, keepdims=True), 1e-12)
        logits = xn @ wn.T
        theta = jnp.arccos(jnp.clip(logits, -1.0 + 1e-7, 1.0 - 1e-7))
        tgt = jnp.cos(theta + m)
        oh = jax.nn.one_hot(label, W.shape[0], dtype=jnp.float32)
        return (logits * (1.0 - oh) + tgt * oh) * s

    ref = reference(x, W, label, s, m)

    # 1) f32-operand MXU path: tight numeric check of the full kernel logic.
    out_f32 = jax.block_until_ready(
        arcface_forward(x, W, label, s=s, m=m, matmul_dtype=jnp.float32))
    assert out_f32.shape == (B, num_classes)
    assert jnp.allclose(out_f32, ref, atol=2e-3, rtol=2e-3), "f32 kernel mismatch"

    # 2) Default bf16-operand MXU path: loose check only (bf16 operand rounding
    #    at F=4 scaled by s=30 can reach a few tenths).
    out_bf16 = jax.block_until_ready(arcface_forward(x, W, label, s=s, m=m))
    assert out_bf16.shape == (B, num_classes)
    assert float(jnp.max(jnp.abs(out_bf16 - ref))) < 1.5, "bf16 kernel mismatch"

    # 3) Multi-tile config (several batch + class tiles, label-free class tiles,
    #    padded classes): exercises the cached-W pl.when, the localized-label
    #    compare, and the has_target fast path.
    B2, F2, C2 = 16, 8, 300
    k_x2, k_w2, k_l2 = jax.random.split(jax.random.PRNGKey(1), 3)
    x2 = jax.random.normal(k_x2, (B2, F2), dtype=jnp.float32)
    W2 = jax.random.normal(k_w2, (C2, F2), dtype=jnp.float32) * 0.1
    label2 = jax.random.randint(k_l2, (B2,), 0, C2, dtype=jnp.int32)
    ref2 = reference(x2, W2, label2, s, m)
    out2 = jax.block_until_ready(
        arcface_forward(x2, W2, label2, s=s, m=m, matmul_dtype=jnp.float32,
                        block_b=8, block_c=128))
    assert out2.shape == (B2, C2)
    assert jnp.allclose(out2, ref2, atol=2e-3, rtol=2e-3), "multi-tile mismatch"

    print("KERNEL_OK")
</pallas_src>

<mosaic_0001>
module attributes {stable_mosaic.version = 11 : i64} {
  func.func @_arcface_kernel(%arg0: i32, %arg1: i32, %arg2: memref<1xi32, #tpu.memory_space<smem>>, %arg3: memref<8x4xf32, #tpu.memory_space<vmem>>, %arg4: memref<128x4xf32, #tpu.memory_space<vmem>>, %arg5: memref<8x1xi32, #tpu.memory_space<vmem>>, %arg6: memref<8x128xf32, #tpu.memory_space<vmem>>, %arg7: memref<128x4xf32, #tpu.memory_space<vmem>>) attributes {dimension_semantics = [#tpu.dimension_semantics<parallel>, #tpu.dimension_semantics<arbitrary>], iteration_bounds = array<i64: 1, 1>, scalar_prefetch = 1 : i64, scratch_operands = 1 : i64, tpu.core_type = #tpu.core_type<tc>, window_params = [{transform_indices = @transform_0, window_bounds = array<i64: 8, 4>}, {transform_indices = @transform_1, window_bounds = array<i64: 128, 4>}, {transform_indices = @transform_2, window_bounds = array<i64: 8, 1>}, {transform_indices = @transform_3, window_bounds = array<i64: 8, 128>}]} {
    %c0_i32 = arith.constant 0 : i32
    %0 = arith.cmpi eq, %arg1, %c0_i32 : i32
    %1 = arith.extui %0 : i1 to i32
    %c0_i32_0 = arith.constant 0 : i32
    %2 = arith.cmpi ne, %1, %c0_i32_0 : i32
    scf.if %2 {
      %c0_9 = arith.constant 0 : index
      %c0_10 = arith.constant 0 : index
      %21 = vector.load %arg4[%c0_9, %c0_10] : memref<128x4xf32, #tpu.memory_space<vmem>>, vector<128x4xf32>
      %22 = arith.mulf %21, %21 : vector<128x4xf32>
      %cst_11 = arith.constant dense<0.000000e+00> : vector<128xf32>
      %23 = vector.multi_reduction <add>, %22, %cst_11 [1] : vector<128x4xf32> to vector<128xf32>
      %24 = vector.shape_cast %23 : vector<128xf32> to vector<128x1xf32>
      %cst_12 = arith.constant 1.000000e-24 : f32
      %25 = vector.broadcast %cst_12 : f32 to vector<128x1xf32>
      %26 = arith.maximumf %24, %25 : vector<128x1xf32>
      %27 = math.rsqrt %26 : vector<128x1xf32>
      %28 = vector.broadcast %27 : vector<128x1xf32> to vector<128x4xf32>
      %29 = arith.mulf %21, %28 : vector<128x4xf32>
      %c0_13 = arith.constant 0 : index
      %c0_14 = arith.constant 0 : index
      %30 = vector.load %arg7[%c0_13, %c0_14] : memref<128x4xf32, #tpu.memory_space<vmem>>, vector<128x4xf32>
      tpu.vector_store %arg7[%c0_13, %c0_14], %29 {strides = array<i32>} : memref<128x4xf32, #tpu.memory_space<vmem>>, vector<128x4xf32>,
    } else {
    }
    %c0 = arith.constant 0 : index
    %c0_1 = arith.constant 0 : index
    %3 = vector.load %arg3[%c0, %c0_1] : memref<8x4xf32, #tpu.memory_space<vmem>>, vector<8x4xf32>
    %c0_2 = arith.constant 0 : index
    %c0_3 = arith.constant 0 : index
    %4 = vector.load %arg7[%c0_2, %c0_3] : memref<128x4xf32, #tpu.memory_space<vmem>>, vector<128x4xf32>
    %cst = arith.constant dense<0.000000e+00> : vector<8x128xf32>
    %5 = tpu.matmul %3, %4, %cst {dimension_numbers = #tpu.dot_dimension_numbers<[1], [1], [0], [0], [0, 0, 1, 0], [], []>} : vector<8x4xf32>, vector<128x4xf32>, vector<8x128xf32> -> vector<8x128xf32>
    %c0_4 = arith.constant 0 : index
    %c0_5 = arith.constant 0 : index
    %6 = vector.load %arg5[%c0_4, %c0_5] : memref<8x1xi32, #tpu.memory_space<vmem>>, vector<8x1xi32>
    %c128_i32 = arith.constant 128 : i32
    %7 = arith.muli %arg0, %c128_i32 : i32
    %8 = vector.broadcast %7 : i32 to vector<8x1xi32>
    %9 = arith.subi %6, %8 : vector<8x1xi32>
    %10 = tpu.iota {dimensions = array<i32: 1>} : vector<8x128xi32>
    %c1_i32 = arith.constant 1 : i32
    %11 = arith.muli %arg1, %c1_i32 : i32
    %12 = arith.addi %11, %arg0 : i32
    %13 = arith.index_cast %12 : i32 to index
    %14 = memref.load %arg2[%13] : memref<1xi32, #tpu.memory_space<smem>>
    %c0_i32_6 = arith.constant 0 : i32
    %15 = arith.cmpi sgt, %14, %c0_i32_6 : i32
    %16 = arith.extui %15 : i1 to i32
    %c0_i32_7 = arith.constant 0 : i32
    %17 = arith.cmpi ne, %16, %c0_i32_7 : i32
    scf.if %17 {
      %cst_9 = arith.constant -0.99999988 : f32
      %cst_10 = arith.constant 0.99999988 : f32
      %21 = vector.broadcast %cst_9 : f32 to vector<8x128xf32>
      %22 = arith.maximumf %21, %5 : vector<8x128xf32>
      %23 = vector.broadcast %cst_10 : f32 to vector<8x128xf32>
      %24 = arith.minimumf %23, %22 : vector<8x128xf32>
      %25 = arith.mulf %24, %24 : vector<8x128xf32>
      %cst_11 = arith.constant 1.000000e+00 : f32
      %26 = vector.broadcast %cst_11 : f32 to vector<8x128xf32>
      %27 = arith.subf %26, %25 : vector<8x128xf32>
      %cst_12 = arith.constant 0.000000e+00 : f32
      %28 = vector.broadcast %cst_12 : f32 to vector<8x128xf32>
      %29 = arith.maximumf %27, %28 : vector<8x128xf32>
      %30 = math.sqrt %29 : vector<8x128xf32>
      %cst_13 = arith.constant 0.87758255 : f32
      %31 = vector.broadcast %cst_13 : f32 to vector<8x128xf32>
      %32 = arith.mulf %24, %31 : vector<8x128xf32>
      %cst_14 = arith.constant 0.47942555 : f32
      %33 = vector.broadcast %cst_14 : f32 to vector<8x128xf32>
      %34 = arith.mulf %30, %33 : vector<8x128xf32>
      %35 = arith.subf %32, %34 : vector<8x128xf32>
      %36 = vector.broadcast %9 : vector<8x1xi32> to vector<8x128xi32>
      %37 = arith.cmpi eq, %10, %36 : vector<8x128xi32>
      %38 = arith.select %37, %35, %5 : vector<8x128xi1>, vector<8x128xf32>
      %cst_15 = arith.constant 3.000000e+01 : f32
      %39 = vector.broadcast %cst_15 : f32 to vector<8x128xf32>
      %40 = arith.mulf %38, %39 : vector<8x128xf32>
      %c0_16 = arith.constant 0 : index
      %c0_17 = arith.constant 0 : index
      %41 = vector.load %arg6[%c0_16, %c0_17] : memref<8x128xf32, #tpu.memory_space<vmem>>, vector<8x128xf32>
      tpu.vector_store %arg6[%c0_16, %c0_17], %40 {strides = array<i32>} : memref<8x128xf32, #tpu.memory_space<vmem>>, vector<8x128xf32>,
    } else {
    }
    %true = arith.constant true
    %18 = arith.xori %15, %true : i1
    %19 = arith.extui %18 : i1 to i32
    %c0_i32_8 = arith.constant 0 : i32
    %20 = arith.cmpi ne, %19, %c0_i32_8 : i32
    scf.if %20 {
      %cst_9 = arith.constant 3.000000e+01 : f32
      %21 = vector.broadcast %cst_9 : f32 to vector<8x128xf32>
      %22 = arith.mulf %5, %21 : vector<8x128xf32>
      %c0_10 = arith.constant 0 : index
      %c0_11 = arith.constant 0 : index
      %23 = vector.load %arg6[%c0_10, %c0_11] : memref<8x128xf32, #tpu.memory_space<vmem>>, vector<8x128xf32>
      tpu.vector_store %arg6[%c0_10, %c0_11], %22 {strides = array<i32>} : memref<8x128xf32, #tpu.memory_space<vmem>>, vector<8x128xf32>,
    } else {
    }
    return
  }
  func.func @transform_0(%arg0: i32, %arg1: i32, %arg2: memref<1xi32, #tpu.memory_space<smem>>) -> (i32, i32) {
    %c0_i32 = arith.constant 0 : i32
    %c0_i32_0 = arith.constant 0 : i32
    return %arg1, %c0_i32 : i32, i32
  }
  func.func @transform_1(%arg0: i32, %arg1: i32, %arg2: memref<1xi32, #tpu.memory_space<smem>>) -> (i32, i32) {
    %c0_i32 = arith.constant 0 : i32
    %c0_i32_0 = arith.constant 0 : i32
    return %arg0, %c0_i32 : i32, i32
  }
  func.func @transform_2(%arg0: i32, %arg1: i32, %arg2: memref<1xi32, #tpu.memory_space<smem>>) -> (i32, i32) {
    %c0_i32 = arith.constant 0 : i32
    %c0_i32_0 = arith.constant 0 : i32
    return %arg1, %c0_i32 : i32, i32
  }
  func.func @transform_3(%arg0: i32, %arg1: i32, %arg2: memref<1xi32, #tpu.memory_space<smem>>) -> (i32, i32) {
    %c0_i32 = arith.constant 0 : i32
    return %arg1, %arg0 : i32, i32
  }
}

</mosaic_0001>

<bundles_post_ra>
// kernel: tpu_custom_call.1
= control target key start
LH: loop header
LB: loop body
LE: loop exit
PB: predicated region body
PF: predicated region fallthrough
CT: control target
= control target key end

     0   :  { %vm53_vm0 = vcmask 31744   ;;  %s970_s0 = inlined_call_operand.<no memory space> [shape: s32[1], index: 0, kind: input, shape index: {}]   ;;  %s971_s1 = inlined_call_operand.vmem [shape: f32[8,4], index: 1, kind: input, shape index: {}]   ;;  %s972_s2 = inlined_call_operand.vmem [shape: f32[128,4], index: 2, kind: input, shape index: {}]   ;;  %s973_s3 = inlined_call_operand.vmem [shape: s32[8,1], index: 3, kind: input, shape index: {}]   ;;  %s974_s4 = inlined_call_operand.hbm [shape: f32[8,128], index: 4, kind: output, shape index: {}]  }
   0x1   :  { %v573_v0 = vld [vmem:[%s972_s2 + $0x78] sm:$0xff]  ;;  %v578_v1 = vld [vmem:[%s972_s2 + $0x68] sm:$0xff]  ;;  %v594_v6 = vld [vmem:[%s972_s2 + $0x70] sm:$0xff] }
   0x2   :  { %v583_v2 = vld [vmem:[%s972_s2 + $0x58] sm:$0xff]  ;;  %v52_v3 = vmul.f32 %v573_v0, %v573_v0  ;;  %v50_v4 = vmul.f32 %v578_v1, %v578_v1  ;;  %v599_v7 = vld [vmem:[%s972_s2 + $0x60] sm:$0xff]  ;;  %v607_v11 = vld [vmem:[%s972_s2 + $0x50] sm:$0xff]  ;;  %v51_v12 = vmul.f32 %v594_v6, %v594_v6 }
   0x3   :  { %v48_v5 = vmul.f32 %v583_v2, %v583_v2  ;;  %v49_v13 = vmul.f32 %v599_v7, %v599_v7 }
   0x4   :  { %v99_v8 = vsel %vm53_vm0, %v52_v3, 0.0  ;;  %v93_v9 = vsel %vm53_vm0, %v50_v4, 0.0 }
   0x5   :  { %v87_v10 = vsel %vm53_vm0, %v48_v5, 0.0  ;;  %100 = vadd.xlane.f32.xlu0 %v99_v8  ;;  %94 = vadd.xlane.f32.xlu1 %v93_v9 }
   0x6   :  { %88 = vadd.xlane.f32.xlu2 %v87_v10 }
   0x7   :  { %10 = vsyncpa [#allocation6], 0  ;;  %v47_v14 = vmul.f32 %v607_v11, %v607_v11  ;;  %v96_v15 = vsel %vm53_vm0, %v51_v12, 0.0  ;;  %v90_v16 = vsel %vm53_vm0, %v49_v13, 0.0  ;;  %v621_v18 = vld [vmem:[%s972_s2 + $0x48] sm:$0xff]  ;;  %v626_v19 = vld [vmem:[%s972_s2 + $0x40] sm:$0xff] }
   0x8   :  { %v631_v20 = vld [vmem:[%s972_s2 + $0x38] sm:$0xff]  ;;  %v46_v21 = vmul.f32 %v621_v18, %v621_v18  ;;  %v45_v22 = vmul.f32 %v626_v19, %v626_v19  ;;  %v645_v27 = vld [vmem:[%s972_s2 + $0x30] sm:$0xff]  ;;  %v650_v28 = vld [vmem:[%s972_s2 + $0x28] sm:$0xff]  ;;  %p477_p0 = scmp.le.s32.totalorder %s970_s0, 0 }
   0x9   :  { %v84_v17 = vsel %vm53_vm0, %v47_v14, 0.0  ;;  %v44_v23 = vmul.f32 %v631_v20, %v631_v20  ;;  %v655_v29 = vld [vmem:[%s972_s2 + $0x20] sm:$0xff]  ;;  %v43_v30 = vmul.f32 %v645_v27, %v645_v27  ;;  %v42_v31 = vmul.f32 %v650_v28, %v650_v28  ;;  %v669_v36 = vld [vmem:[%s972_s2 + $0x18] sm:$0xff]  ;;  %v674_v37 = vld [vmem:[%s972_s2 + $0x10] sm:$0xff] }
   0xa   :  { %v81_v24 = vsel %vm53_vm0, %v46_v21, 0.0  ;;  %v78_v25 = vsel %vm53_vm0, %v45_v22, 0.0  ;;  %v41_v32 = vmul.f32 %v655_v29, %v655_v29  ;;  %v679_v38 = vld [vmem:[%s972_s2 + $0x8] sm:$0xff]  ;;  %v40_v39 = vmul.f32 %v669_v36, %v669_v36  ;;  %v693_v45 = vld [vmem:[%s972_s2] sm:$0xff] }
   0xb   :  { %v75_v26 = vsel %vm53_vm0, %v44_v23, 0.0  ;;  %v72_v33 = vsel %vm53_vm0, %v43_v30, 0.0  ;;  %v69_v34 = vsel %vm53_vm0, %v42_v31, 0.0  ;;  %v39_v40 = vmul.f32 %v674_v37, %v674_v37 }
   0xc   :  { %v66_v35 = vsel %vm53_vm0, %v41_v32, 0.0  ;;  %v38_v41 = vmul.f32 %v679_v38, %v679_v38  ;;  %v63_v42 = vsel %vm53_vm0, %v40_v39, 0.0  ;;  %v37_v46 = vmul.f32 %v693_v45, %v693_v45 }
   0xd   :  { %97 = vadd.xlane.f32.xlu0 %v96_v15  ;;  %91 = vadd.xlane.f32.xlu1 %v90_v16  ;;  %v60_v43 = vsel %vm53_vm0, %v39_v40, 0.0 }
   0xe   :  { %85 = vadd.xlane.f32.xlu2 %v84_v17  ;;  %v57_v44 = vsel %vm53_vm0, %v38_v41, 0.0  ;;  %v54_v47 = vsel %vm53_vm0, %v37_v46, 0.0 }
  0x15   :  { %82 = vadd.xlane.f32.xlu0 %v81_v24  ;;  %79 = vadd.xlane.f32.xlu1 %v78_v25 }
  0x16   :  { %76 = vadd.xlane.f32.xlu2 %v75_v26 }
  0x1d   :  { %73 = vadd.xlane.f32.xlu0 %v72_v33  ;;  %70 = vadd.xlane.f32.xlu1 %v69_v34 }
  0x1e   :  { %67 = vadd.xlane.f32.xlu2 %v66_v35 }
  0x25   :  { %64 = vadd.xlane.f32.xlu0 %v63_v42  ;;  %61 = vadd.xlane.f32.xlu1 %v60_v43 }
  0x26   :  { %58 = vadd.xlane.f32.xlu2 %v57_v44 }
  0x2d   :  { %55 = vadd.xlane.f32.xlu0 %v54_v47 }
  0x78   :  { %v101_v48 = vpop.xlane.xlu0 %100  ;;  %v95_v49 = vpop.xlane.xlu1 %94 }
  0x79   :  { %v117_v50 = vmax.f32 %v101_v48, 1e-24  ;;  %v115_v51 = vmax.f32 %v95_v49, 1e-24  ;;  %v89_v52 = vpop.xlane.xlu2 %88 }
  0x7a   :  { %v113_v53 = vmax.f32 %v89_v52, 1e-24 }
  0x7b   :  { %482 = vrsqrt.f32 %v117_v50  ;;  %vm274_vm1 = vweird.f32 %v117_v50  ;;  %vm254_vm3 = vweird.f32 %v115_v51 }
  0x7c   :  { %484 = vrsqrt.f32 %v115_v51  ;;  %vm234_vm4 = vweird.f32 %v113_v53 }
  0x7d   :  { %486 = vrsqrt.f32 %v113_v53 }
  0x80   :  { %v98_v54 = vpop.xlane.xlu0 %97  ;;  %v92_v55 = vpop.xlane.xlu1 %91 }
  0x81   :  { %v483_v56 = vpop.eup %482  ;;  %v698_v57 = vmax.f32 %v98_v54, 1e-24  ;;  %v700_v58 = vmax.f32 %v92_v55, 1e-24  ;;  %v86_v59 = vpop.xlane.xlu2 %85 }
  0x82   :  { %v485_v60 = vpop.eup %484  ;;  %v269_v61 = vmul.f32 %v483_v56, %v117_v50  ;;  %v702_v62 = vmax.f32 %v86_v59, 1e-24  ;;  %vm275_vm2 = vweird.f32 %v483_v56 }
  0x83   :  { %v487_v63 = vpop.eup %486  ;;  %v249_v3 = vmul.f32 %v485_v60, %v115_v51  ;;  %488 = vrsqrt.f32 %v698_v57  ;;  %vm255_vm6 = vweird.f32 %v485_v60  ;;  %vm264_vm7 = vweird.f32 %v698_v57  ;;  %vm714_vm8 = vmor %vm274_vm1, %vm275_vm2 }
  0x84   :  { %v270_v4 = vmul.f32 %v483_v56, %v269_v61  ;;  %v229_v5 = vmul.f32 %v487_v63, %v113_v53  ;;  %490 = vrsqrt.f32 %v700_v58  ;;  %vm235_vm5 = vweird.f32 %v487_v63  ;;  %vm256_vm11 = vmor %vm254_vm3, %vm255_vm6 }
  0x85   :  { %v250_v8 = vmul.f32 %v485_v60, %v249_v3  ;;  %492 = vrsqrt.f32 %v702_v62  ;;  %vm244_vm9 = vweird.f32 %v700_v58  ;;  %vm723_vm10 = vmor %vm234_vm4, %vm235_vm5  ;;  %vm224_vm12 = vweird.f32 %v702_v62 }
  0x86   :  { %v271_v9 = vmul.f32 0.5, %v270_v4  ;;  %v230_v10 = vmul.f32 %v487_v63, %v229_v5 }
  0x87   :  { %v251_v12 = vmul.f32 0.5, %v250_v8 }
  0x88   :  { %v272_v13 = vsub.f32 1.5, %v271_v9  ;;  %v231_v14 = vmul.f32 0.5, %v230_v10  ;;  %v83_v15 = vpop.xlane.xlu0 %82  ;;  %v80_v16 = vpop.xlane.xlu1 %79 }
  0x89   :  { %v707_v17 = vpop.eup %488  ;;  %v252_v21 = vsub.f32 1.5, %v251_v12  ;;  %v710_v22 = vmax.f32 %v83_v15, 1e-24  ;;  %v729_v35 = vmax.f32 %v80_v16, 1e-24  ;;  %v77_v43 = vpop.xlane.xlu2 %76 }
  0x8a   :  { %v491_v23 = vpop.eup %490  ;;  %v273_v24 = vmul.f32 %v483_v56, %v272_v13  ;;  %v232_v26 = vsub.f32 1.5, %v231_v14  ;;  %v259_v30 = vmul.f32 %v707_v17, %v698_v57  ;;  %vm265_vm13 = vweird.f32 %v707_v17 }
  0x8b   :  { %v493_v31 = vpop.eup %492  ;;  %v253_v32 = vmul.f32 %v485_v60, %v252_v21  ;;  %v239_v34 = vmul.f32 %v491_v23, %v700_v58  ;;  %494 = vrsqrt.f32 %v710_v22  ;;  %vm245_vm15 = vweird.f32 %v491_v23  ;;  %vm266_vm1 = vmor %vm264_vm7, %vm265_vm13 }
  0x8c   :  { %v277_v39 = vsel %vm714_vm8, %v483_v56, %v273_v24  ;;  %v233_v40 = vmul.f32 %v487_v63, %v232_v26  ;;  %v260_v41 = vmul.f32 %v707_v17, %v259_v30  ;;  %v219_v42 = vmul.f32 %v493_v31, %v702_v62  ;;  %vm246_vm3 = vmor %vm244_vm9, %vm245_vm15 }
  0x8d   :  { %v293_v44 = vmul.f32 %v277_v39, %v573_v0  ;;  %v257_v46 = vsel %vm256_vm11, %v485_v60, %v253_v32  ;;  %v240_v47 = vmul.f32 %v491_v23, %v239_v34  ;;  %496 = vrsqrt.f32 %v729_v35 }
  0x8e   :  { %v291_v48 = vmul.f32 %v257_v46, %v578_v1  ;;  %v237_v49 = vsel %vm723_vm10, %v487_v63, %v233_v40  ;;  %v261_v50 = vmul.f32 0.5, %v260_v41  ;;  %v220_v51 = vmul.f32 %v493_v31, %v219_v42 }
  0x8f   :  { %309 = vst.msk [vmem:[#allocation2 + $0x78] sm:$0xff] %vm53_vm0, %v293_v44  ;;  %v289_v52 = vmul.f32 %v237_v49, %v583_v2  ;;  %v241_v53 = vmul.f32 0.5, %v240_v47  ;;  %vm225_vm14 = vweird.f32 %v493_v31  ;;  %v747_v1 = vmax.f32 %v77_v43, 1e-24 }
  0x90   :  { %307 = vst.msk [vmem:[#allocation2 + $0x68] sm:$0xff] %vm53_vm0, %v291_v48  ;;  %v262_v0 = vsub.f32 1.5, %v261_v50  ;;  %v221_v54 = vmul.f32 0.5, %v220_v51  ;;  %v74_v55 = vpop.xlane.xlu0 %73  ;;  %v71_v56 = vpop.xlane.xlu1 %70  ;;  %vm763_vm2 = vmor %vm224_vm12, %vm225_vm14  ;;  %vm214_vm4 = vweird.f32 %v710_v22  ;;  %vm204_vm6 = vweird.f32 %v729_v35 }
  0x91   :  { %v495_v59 = vpop.eup %494  ;;  %305 = vst.msk [vmem:[#allocation2 + $0x58] sm:$0xff] %vm53_vm0, %v289_v52  ;;  %v242_v60 = vsub.f32 1.5, %v241_v53  ;;  %v750_v2 = vmax.f32 %v74_v55, 1e-24  ;;  %v752_v61 = vmax.f32 %v71_v56, 1e-24  ;;  %498 = vrsqrt.f32 %v747_v1  ;;  %v68_v12 = vpop.xlane.xlu2 %67 }
  0x92   :  { %v263_v63 = vmul.f32 %v707_v17, %v262_v0  ;;  %v222_v3 = vsub.f32 1.5, %v221_v54  ;;  %v209_v4 = vmul.f32 %v495_v59, %v710_v22  ;;  %vm215_vm5 = vweird.f32 %v495_v59 }
  0x93   :  { %v243_v5 = vmul.f32 %v491_v23, %v242_v60  ;;  %500 = vrsqrt.f32 %v750_v2  ;;  %v772_v13 = vpop.eup %496  ;;  %vm216_vm8 = vmor %vm214_vm4, %vm215_vm5  ;;  %vm194_vm9 = vweird.f32 %v747_v1  ;;  %vm184_vm10 = vweird.f32 %v750_v2 }
  0x94   :  { %v267_v9 = vsel %vm266_vm1, %v707_v17, %v263_v63  ;;  %v223_v57 = vmul.f32 %v493_v31, %v222_v3  ;;  %v210_v10 = vmul.f32 %v495_v59, %v209_v4  ;;  %502 = vrsqrt.f32 %v752_v61 }
  0x95   :  { %v292_v62 = vmul.f32 %v267_v9, %v594_v6  ;;  %v247_v14 = vsel %vm246_vm3, %v491_v23, %v243_v5  ;;  %v199_v58 = vmul.f32 %v772_v13, %v729_v35  ;;  %v784_v6 = vmax.f32 %v68_v12, 1e-24 }
  0x96   :  { %v290_v15 = vmul.f32 %v247_v14, %v599_v7  ;;  %v227_v16 = vsel %vm763_vm2, %v493_v31, %v223_v57  ;;  %v211_v17 = vmul.f32 0.5, %v210_v10  ;;  %v326_v21 = vld [vmem:[#allocation2 + $0x78] sm:$0xff]  ;;  %vm205_vm7 = vweird.f32 %v772_v13 }
  0x97   :  { %308 = vst.msk [vmem:[#allocation2 + $0x70] sm:$0xff] %vm53_vm0, %v292_v62  ;;  %v288_v24 = vmul.f32 %v227_v16, %v607_v11  ;;  %460 = vmatpush.xpose.msk.msra.mxu0 %vm53_vm0, %v326_v21  ;;  %v200_v7 = vmul.f32 %v772_v13, %v199_v58  ;;  %v789_v30 = vpop.eup %498  ;;  %504 = vrsqrt.f32 %v784_v6  ;;  %vm819_vm11 = vmor %vm204_vm6, %vm205_vm7  ;;  %vm174_vm12 = vweird.f32 %v752_v61  ;;  %v324_v10 = vld [vmem:[#allocation2 + $0x68] sm:$0xff] }
  0x98   :  { %306 = vst.msk [vmem:[#allocation2 + $0x60] sm:$0xff] %vm53_vm0, %v290_v15  ;;  %v212_v23 = vsub.f32 1.5, %v211_v17  ;;  %v65_v25 = vpop.xlane.xlu0 %64  ;;  %v62_v26 = vpop.xlane.xlu1 %61  ;;  %v189_v39 = vmul.f32 %v789_v30, %v747_v1  ;;  %vm195_vm13 = vweird.f32 %v789_v30  ;;  %vm164_vm2 = vweird.f32 %v784_v6 }
  0x99   :  { %304 = vst.msk [vmem:[#allocation2 + $0x50] sm:$0xff] %vm53_vm0, %v288_v24  ;;  %v794_v11 = vmax.f32 %v65_v25, 1e-24  ;;  %v796_v31 = vmax.f32 %v62_v26, 1e-24  ;;  %v798_v32 = vpop.eup %500  ;;  %v201_v34 = vmul.f32 0.5, %v200_v7  ;;  %v59_v47 = vpop.xlane.xlu2 %58  ;;  %vm849_vm1 = vmor %vm194_vm9, %vm195_vm13 }
  0x9a   :  { %v213_v33 = vmul.f32 %v495_v59, %v212_v23  ;;  %v803_v40 = vpop.eup %502  ;;  %v179_v41 = vmul.f32 %v798_v32, %v750_v2  ;;  %v190_v44 = vmul.f32 %v789_v30, %v189_v39  ;;  %vm185_vm14 = vweird.f32 %v798_v32 }
  0x9b   :  { %506 = vrsqrt.f32 %v794_v11  ;;  %v202_v43 = vsub.f32 1.5, %v201_v34  ;;  %v169_v46 = vmul.f32 %v803_v40, %v752_v61  ;;  %vm175_vm15 = vweird.f32 %v803_v40  ;;  %vm860_vm3 = vmor %vm184_vm10, %vm185_vm14 }
  0x9c   :  { %v217_v42 = vsel %vm216_vm8, %v495_v59, %v213_v33  ;;  %v180_v49 = vmul.f32 %v798_v32, %v179_v41  ;;  %508 = vrsqrt.f32 %v796_v31  ;;  %v191_v51 = vmul.f32 0.5, %v190_v44  ;;  %vm873_vm4 = vmor %vm174_vm12, %vm175_vm15 }
  0x9d   :  { %v287_v22 = vmul.f32 %v217_v42, %v621_v18  ;;  %v203_v50 = vmul.f32 %v772_v13, %v202_v43  ;;  %v170_v52 = vmul.f32 %v803_v40, %v169_v46  ;;  %v829_v53 = vpop.eup %504  ;;  %v835_v0 = vmax.f32 %v59_v47, 1e-24  ;;  %v322_v43 = vld [vmem:[#allocation2 + $0x58] sm:$0xff] }
  0x9e   :  { %v325_v18 = vld [vmem:[#allocation2 + $0x70] sm:$0xff]  ;;  %v181_v35 = vmul.f32 0.5, %v180_v49  ;;  %v192_v55 = vsub.f32 1.5, %v191_v51  ;;  %v159_v59 = vmul.f32 %v829_v53, %v784_v6  ;;  %vm165_vm5 = vweird.f32 %v829_v53 }
  0x9f   :  { %303 = vst.msk [vmem:[#allocation2 + $0x48] sm:$0xff] %vm53_vm0, %v287_v22  ;;  %461 = vmatpush.xpose.msk.msra.mxu0 %vm53_vm0, %v325_v18  ;;  %v207_v54 = vsel %vm819_vm11, %v772_v13, %v203_v50  ;;  %v171_v56 = vmul.f32 0.5, %v170_v52  ;;  %510 = vrsqrt.f32 %v835_v0  ;;  %vm154_vm6 = vweird.f32 %v794_v11  ;;  %v323_v26 = vld [vmem:[#allocation2 + $0x60] sm:$0xff]  ;;  %vm903_vm8 = vmor %vm164_vm2, %vm165_vm5 }
  0xa0   :  { %v56_v60 = vpop.xlane.xlu0 %55  ;;  %v286_v3 = vmul.f32 %v207_v54, %v626_v19  ;;  %v182_v5 = vsub.f32 1.5, %v181_v35  ;;  %v193_v8 = vmul.f32 %v789_v30, %v192_v55  ;;  %v160_v9 = vmul.f32 %v829_v53, %v159_v59  ;;  %v321_v50 = vld [vmem:[#allocation2 + $0x50] sm:$0xff] }
  0xa1   :  { %v842_v63 = vpop.eup %506  ;;  %v172_v1 = vsub.f32 1.5, %v171_v56  ;;  %v880_v62 = vmax.f32 %v56_v60, 1e-24  ;;  %vm144_vm10 = vweird.f32 %v796_v31  ;;  %vm134_vm13 = vweird.f32 %v835_v0 }
  0xa2   :  { %v149_v57 = vmul.f32 %v842_v63, %v794_v11  ;;  %v509_v12 = vpop.eup %508  ;;  %302 = vst.msk [vmem:[#allocation2 + $0x40] sm:$0xff] %vm53_vm0, %v286_v3  ;;  %v183_v13 = vmul.f32 %v798_v32, %v182_v5  ;;  %v197_v14 = vsel %vm849_vm1, %v789_v30, %v193_v8  ;;  %v161_v16 = vmul.f32 0.5, %v160_v9  ;;  %v399_v9 = vld [vmem:[%s973_s3] sm:$0xff] }
  0xa3   :  { %462 = vmatpush.xpose.msk.msra.mxu0 %vm53_vm0, %v324_v10  ;;  %v173_v15 = vmul.f32 %v803_v40, %v172_v1  ;;  %v285_v17 = vmul.f32 %v197_v14, %v631_v20  ;;  %vm155_vm7 = vweird.f32 %v842_v63  ;;  %v139_v21 = vmul.f32 %v509_v12, %v796_v31  ;;  %v310_v1 = vld [vmem:[%s971_s1] sm:$0xff] }
  0xa4   :  { %v150_v61 = vmul.f32 %v842_v63, %v149_v57  ;;  %v187_v58 = vsel %vm860_vm3, %v798_v32, %v183_v13  ;;  %v162_v7 = vsub.f32 1.5, %v161_v16  ;;  %512 = vrsqrt.f32 %v880_v62  ;;  %vm917_vm9 = vmor %vm154_vm6, %vm155_vm7 }
  0xa5   :  { %v284_v24 = vmul.f32 %v187_v58, %v645_v27  ;;  %v177_v23 = vsel %vm873_vm4, %v803_v40, %v173_v15  ;;  %v511_v30 = vpop.eup %510  ;;  %301 = vst.msk [vmem:[#allocation2 + $0x38] sm:$0xff] %vm53_vm0, %v285_v17  ;;  %v140_v27 = vmul.f32 %v509_v12, %v139_v21  ;;  %vm145_vm11 = vweird.f32 %v509_v12 }
  0xa6   :  { %v151_v25 = vmul.f32 0.5, %v150_v61  ;;  %v283_v20 = vmul.f32 %v177_v23, %v650_v28  ;;  %v163_v33 = vmul.f32 %v829_v53, %v162_v7  ;;  %v129_v28 = vmul.f32 %v511_v30, %v835_v0  ;;  %vm146_vm12 = vmor %vm144_vm10, %vm145_vm11 }
  0xa7   :  { %463 = vmatpush.xpose.msk.msra.mxu0 %vm53_vm0, %v323_v26  ;;  %300 = vst.msk [vmem:[#allocation2 + $0x30] sm:$0xff] %vm53_vm0, %v284_v24  ;;  %v141_v39 = vmul.f32 0.5, %v140_v27  ;;  %vm135_vm14 = vweird.f32 %v511_v30  ;;  %vm124_vm1 = vweird.f32 %v880_v62  ;;  %v403_v57 = vlaneseq }
  0xa8   :  { %v152_v34 = vsub.f32 1.5, %v151_v25  ;;  %299 = vst.msk [vmem:[#allocation2 + $0x28] sm:$0xff] %vm53_vm0, %v283_v20  ;;  %v167_v40 = vsel %vm903_vm8, %v829_v53, %v163_v33  ;;  %v130_v42 = vmul.f32 %v511_v30, %v129_v28  ;;  %vm136_vm15 = vmor %vm134_vm13, %vm135_vm14 }
  0xa9   :  { %v282_v44 = vmul.f32 %v167_v40, %v655_v29  ;;  %v142_v46 = vsub.f32 1.5, %v141_v39  ;;  %v404_v10 = vand.u32 127, %v403_v57 }
  0xaa   :  { %v153_v41 = vmul.f32 %v842_v63, %v152_v34  ;;  %v131_v31 = vmul.f32 0.5, %v130_v42  ;;  %v513_v47 = vpop.eup %512 }
  0xab   :  { %464 = vmatpush.xpose.msk.msra.mxu0 %vm53_vm0, %v322_v43  ;;  %298 = vst.msk [vmem:[#allocation2 + $0x20] sm:$0xff] %vm53_vm0, %v282_v44  ;;  %v143_v48 = vmul.f32 %v509_v12, %v142_v46  ;;  %v119_v29 = vmul.f32 %v513_v47, %v880_v62  ;;  %vm125_vm2 = vweird.f32 %v513_v47 }
  0xac   :  { %v157_v11 = vsel %vm917_vm9, %v842_v63, %v153_v41  ;;  %v132_v49 = vsub.f32 1.5, %v131_v31  ;;  %vm126_vm3 = vmor %vm124_vm1, %vm125_vm2  ;;  %v318_v63 = vld [vmem:[#allocation2 + $0x38] sm:$0xff] }
  0xad   :  { %v281_v22 = vmul.f32 %v157_v11, %v669_v36  ;;  %v147_v51 = vsel %vm146_vm12, %v509_v12, %v143_v48  ;;  %v120_v53 = vmul.f32 %v513_v47, %v119_v29  ;;  %v320_v36 = vld [vmem:[#allocation2 + $0x48] sm:$0xff] }
  0xae   :  { %v280_v52 = vmul.f32 %v147_v51, %v674_v37  ;;  %v133_v18 = vmul.f32 %v511_v30, %v132_v49  ;;  %v319_v37 = vld [vmem:[#allocation2 + $0x40] sm:$0xff]  ;;  %v317_v3 = vld [vmem:[#allocation2 + $0x30] sm:$0xff] }
  0xaf   :  { %297 = vst.msk [vmem:[#allocation2 + $0x18] sm:$0xff] %vm53_vm0, %v281_v22  ;;  %465 = vmatpush.xpose.msk.msra.mxu0 %vm53_vm0, %v321_v50  ;;  %v121_v0 = vmul.f32 0.5, %v120_v53 }
  0xb0   :  { %296 = vst.msk [vmem:[#allocation2 + $0x10] sm:$0xff] %vm53_vm0, %v280_v52  ;;  %v137_v35 = vsel %vm136_vm15, %v511_v30, %v133_v18 }
  0xb1   :  { %v279_v54 = vmul.f32 %v137_v35, %v679_v38  ;;  %v122_v55 = vsub.f32 1.5, %v121_v0  ;;  %v316_v38 = vld [vmem:[#allocation2 + $0x28] sm:$0xff] }
  0xb2   :  { %v315_v4 = vld [vmem:[#allocation2 + $0x20] sm:$0xff] }
  0xb3   :  { %466 = vmatpush.xpose.msk.msra.mxu0 %vm53_vm0, %v320_v36  ;;  %295 = vst.msk [vmem:[#allocation2 + $0x8] sm:$0xff] %vm53_vm0, %v279_v54  ;;  %v123_v56 = vmul.f32 %v513_v47, %v122_v55 }
  0xb5   :  { %v127_v59 = vsel %vm126_vm3, %v513_v47, %v123_v56 }
  0xb6   :  { %v278_v60 = vmul.f32 %v127_v59, %v693_v45  ;;  %v314_v5 = vld [vmem:[#allocation2 + $0x18] sm:$0xff] }
  0xb7   :  { %467 = vmatpush.xpose.msk.msra.mxu0 %vm53_vm0, %v319_v37  ;;  %v313_v8 = vld [vmem:[#allocation2 + $0x10] sm:$0xff] }
  0xb8   :  { %294 = vst.msk [vmem:[#allocation2] sm:$0xff] %vm53_vm0, %v278_v60 }
  0xba   :  { %v312_v45 = vld [vmem:[#allocation2 + $0x8] sm:$0xff] }
  0xbb   :  { %468 = vmatpush.xpose.msk.msra.mxu0 %vm53_vm0, %v318_v63 }
  0xbf   :  { %469 = vmatpush.xpose.msk.msra.mxu0 %vm53_vm0, %v317_v3  ;;  %v311_v19 = vld [vmem:[#allocation2] sm:$0xff] }
  0xc3   :  { %470 = vmatpush.xpose.msk.msra.mxu0 %vm53_vm0, %v316_v38 }
  0xc7   :  { %471 = vmatpush.xpose.msk.msra.mxu0 %vm53_vm0, %v315_v4 }
  0xcb   :  { %472 = vmatpush.xpose.msk.msra.mxu0 %vm53_vm0, %v314_v5 }
  0xcf   :  { %473 = vmatpush.xpose.msk.msra.mxu0 %vm53_vm0, %v313_v8 }
  0xd3   :  { %474 = vmatpush.xpose.msk.msra.mxu0 %vm53_vm0, %v312_v45 }
  0xd7   :  { %475 = vmatpush.xpose.msk.msra.mxu0 %vm53_vm0, %v311_v19 }
  0xda   :  { %476 = vmatmul.msk.f32.vlgmr.msra.gmra.mxu0 %vm53_vm0, %v310_v1 }
 0x153   :  { %410 = sbr.rel (%p477_p0) target bundleno = 466 (0x1d2), region = 21 }
 0x157   :  { %v396_v12 = vpop.f32.mrf.mxu0 }
 0x158   :  { %v543_v13 = vmov 0   ;;  %v478_v2 = vclamps-f32 %v396_v12, 0.9999999 }
 0x159   :  { %514 = vset.pattern.permute.xlu0 %v543_v13 }
 0x15a   :  { %432 = vperm.xlu0 %514, %v399_v9   ;;  %v413_v62 = vmul.f32 %v478_v2, %v478_v2  ;;  %v428_v30 = vmul.f32 0.87758255, %v478_v2 }
 0x15c   :  { %v414_v14 = vsub.f32 1.0, %v413_v62 }
 0x15e   :  { %v415_v15 = vmax.f32 %v414_v14, 0.0 }
 0x160   :  { %515 = vrsqrt.f32 %v415_v15  ;;  %vm423_vm0 = vcmp.eq.f32.partialorder %v415_v15, inf  ;;  %v426_v7 = vand.u32 2147483648, %v415_v15  ;;  %vm425_vm4 = vcmp.eq.f32.partialorder %v415_v15, 0.0 }
 0x166   :  { %v516_v16 = vpop.eup %515 }
 0x167   :  { %v417_v61 = vmul.f32 %v516_v16, %v415_v15 }
 0x169   :  { %v418_v17 = vmul.f32 %v516_v16, %v417_v61 }
 0x16b   :  { %v419_v58 = vmul.f32 0.5, %v418_v17 }
 0x16d   :  { %v420_v21 = vsub.f32 1.5, %v419_v58 }
 0x16f   :  { %v421_v24 = vmul.f32 %v516_v16, %v420_v21 }
 0x171   :  { %v422_v23 = vmul.f32 %v421_v24, %v415_v15 }
 0x173   :  { %v424_v25 = vsel %vm423_vm0, %v415_v15, %v422_v23 }
 0x174   :  { %v427_v26 = vsel %vm425_vm4, %v426_v7, %v424_v25 }
 0x175   :  { %v429_v20 = vmul.f32 0.47942555, %v427_v26 }
 0x177   :  { %v430_v32 = vsub.f32 %v428_v30, %v429_v20 }
 0x1cc   :  { %v433_v27 = vpop.permute.xlu0 %432 }
 0x1cd   :  { %vm434_vm5 = vcmp.eq.s32.totalorder %v404_v10, %v433_v27 }
 0x1ce   :  { %v435_v33 = vsel %vm434_vm5, %v430_v32, %v396_v12 }
 0x1cf   :  { %v436_v34 = vmul.f32 30.0, %v435_v33 }
 0x1d1   :  { %437 = vst [vmem:[#allocation5] sm:$0xff] %v436_v34 }
 0x1d2 PF:  { %p479_p1 = scmp.gt.s32.totalorder %s970_s0, 0 }
 0x1d4   :  { %441 = sbr.rel (%p479_p1) target bundleno = 476 (0x1dc), region = 25 }
 0x1d9   :  { %v442_v28 = vmul.f32 30.0, %v396_v12 }
 0x1db   :  { %443 = vst [vmem:[#allocation5] sm:$0xff] %v442_v28 }
 0x1dc PF:  { %s451_s28 = sshll.u32 %s974_s4, 4  ;;  %s544_s29 = smov [#allocation5]   ;;  %s452_s28 = int_to_ptr.hbm [resolvable:$true] %s451_s28 }
 0x1dd   :  { %s449_s30 = sshll.u32 %s544_s29, 4  ;;  %s450_s30 = int_to_ptr.vmem [resolvable:$true] %s449_s30 }
 0x1de   :  { %454 = dma.vmem_to_hbm [thread:$0]  %s450_s30, 128, %s452_s28, [#allocation6]  }
 0x1df   :  { %541 = dma.done.wait [#allocation6], 128  }
 0x1e0   :  { %542 = vsyncadd [#allocation6], 4294967168 }
 0x1e1   :  { %459 = vsyncpa [#allocation6], 1 }

</bundles_post_ra>
